<compile_context>
chip_gen: v7x
topology: tpu7x:2x2x1
jax: 0.10.0
libtpu: 0.0.40
codegen_flags: <defaults>
</compile_context>

<pallas_src>
import jax
import jax.numpy as jnp
from jax.experimental import pallas as pl
from jax.experimental.pallas import tpu as pltpu

NUM_CLASSES = 10
PAD_CLASSES = 128          # lane-dense output width (multiple of 128)
K_IN = 784
H3 = 64
H3_PAD = 128               # fc3 hidden width padded to a full lane tile

# TODO(synk): optional fp8 path for fc1 on v7x (accuracy-gated) not implemented; bf16 everywhere.


def _cdiv(a, b):
    return -(-a // b)


def _round_up(a, m):
    return _cdiv(a, m) * m


def mlp_kernel(x_ref, w1_ref, b1_ref, w2_ref, b2_ref, w3_ref, b3_ref,
               w4_ref, b4_ref, o_ref):
    # fc1 + relu  (x arrives f32, cast to bf16 here; f32 accumulation on the MXU)
    h = jnp.dot(x_ref[...].astype(jnp.bfloat16), w1_ref[...],
                preferred_element_type=jnp.float32)
    h = jnp.maximum(h + b1_ref[...], 0.0)
    # fc2 + relu
    h = jnp.dot(h.astype(jnp.bfloat16), w2_ref[...],
                preferred_element_type=jnp.float32)
    h = jnp.maximum(h + b2_ref[...], 0.0)
    # fc3 + relu (hidden width padded to 128; padded columns stay exactly 0)
    h = jnp.dot(h.astype(jnp.bfloat16), w3_ref[...],
                preferred_element_type=jnp.float32)
    h = jnp.maximum(h + b3_ref[...], 0.0)
    # out layer (padded to 128 lanes).  The padded-lane mask is baked into b4 (-1e30),
    # so no iota / where is needed; exp underflows those lanes to exactly 0.
    logits = jnp.dot(h.astype(jnp.bfloat16), w4_ref[...],
                     preferred_element_type=jnp.float32) + b4_ref[...]
    m = jnp.max(logits, axis=-1, keepdims=True)
    e = jnp.exp(logits - m)
    denom = jnp.sum(e, axis=-1, keepdims=True)
    o_ref[...] = (e / denom).astype(o_ref.dtype)     # exact division: rows sum to 1


def network_forward(x, params, *, tile_b=1024):
    """x: (B, 1, 28, 28) float32 (NCHW, like PyTorch). Returns (B, 10) softmax probs."""
    w1, b1, w2, b2, w3, b3, w4, b4 = params
    B = x.shape[0]
    x_flat = x.reshape(B, -1)                        # == x.view(x.shape[0], -1); stays f32
    assert x_flat.shape[1] == K_IN

    # Weights -> bf16 (tiny; resident in VMEM across all grid steps). Biases stay f32.
    w1p = w1.astype(jnp.bfloat16)
    w2p = w2.astype(jnp.bfloat16)
    # fc3 hidden width 64 -> 128 (lane-dense fc3 output / fc4 operand); logits unchanged.
    w3p = jnp.pad(w3, ((0, 0), (0, H3_PAD - H3))).astype(jnp.bfloat16)
    b3p = jnp.pad(b3, ((0, 0), (0, H3_PAD - H3)))
    w4p = jnp.pad(w4, ((0, H3_PAD - H3), (0, PAD_CLASSES - NUM_CLASSES))).astype(jnp.bfloat16)
    # Bake the class-padding softmax mask into the f32 bias.
    b4p = jnp.concatenate(
        [b4, jnp.full((1, PAD_CLASSES - NUM_CLASSES), -1e30, jnp.float32)], axis=1)

    # Batch tiling: tiny batches run as a single block; otherwise use >= 2 grid steps
    # (v7x megacore) with tiles of at most tile_b rows (multiple of 8).
    if B < 16:
        n_tiles, tb = 1, B
    else:
        n_tiles = max(2, _cdiv(B, tile_b))
        tb = _round_up(_cdiv(B, n_tiles), 8)
    Bp = n_tiles * tb
    if Bp != B:
        x_flat = jnp.pad(x_flat, ((0, Bp - B), (0, 0)))

    def full(arr):
        # whole-array block (weights/biases resident; same block index every step => no re-DMA)
        return pl.BlockSpec(arr.shape, lambda i, a=arr: (0,) * a.ndim)

    out = pl.pallas_call(
        mlp_kernel,
        out_shape=jax.ShapeDtypeStruct((Bp, PAD_CLASSES), jnp.float32),
        grid_spec=pltpu.PrefetchScalarGridSpec(
            num_scalar_prefetch=0,
            grid=(n_tiles,),
            in_specs=[
                pl.BlockSpec((tb, K_IN), lambda i: (i, 0)),   # f32 x tile, full-K block
                full(w1p), full(b1),
                full(w2p), full(b2),
                full(w3p), full(b3p),
                full(w4p), full(b4p),
            ],
            out_specs=pl.BlockSpec((tb, PAD_CLASSES), lambda i: (i, 0)),
        ),
        compiler_params=pltpu.CompilerParams(
            dimension_semantics=("parallel",),
            vmem_limit_bytes=32 * 1024 * 1024,   # covers tb=1024 double buffers, incl. v5e
        ),
    )(x_flat, w1p, b1, w2p, b2, w3p, b3p, w4p, b4p)

    return out[:B, :NUM_CLASSES]


def init_params(key):
    """Deterministic init mimicking PyTorch nn.Linear default (U[-1/sqrt(fan_in), +1/sqrt(fan_in)]).
    Weights stored as (in_features, out_features); biases as (1, out_features)."""
    dims = [(784, 256), (256, 128), (128, 64), (64, 10)]
    params = []
    for (fan_in, fan_out) in dims:
        key, kw, kb = jax.random.split(key, 3)
        bound = 1.0 / jnp.sqrt(float(fan_in))
        w = jax.random.uniform(kw, (fan_in, fan_out), jnp.float32, -bound, bound)
        b = jax.random.uniform(kb, (1, fan_out), jnp.float32, -bound, bound)
        params += [w, b]
    return tuple(params)


def _reference(x, params):
    w1, b1, w2, b2, w3, b3, w4, b4 = params
    h = jnp.maximum(x.reshape(x.shape[0], -1) @ w1 + b1, 0.0)
    h = jnp.maximum(h @ w2 + b2, 0.0)
    h = jnp.maximum(h @ w3 + b3, 0.0)
    return jax.nn.softmax(h @ w4 + b4, axis=1)


if __name__ == "__main__":
    key = jax.random.PRNGKey(0)
    kx, kp = jax.random.split(key)
    params = init_params(kp)

    # Small batch: single-block path.
    B = 8
    x = jax.random.normal(kx, (B, 1, 28, 28), jnp.float32)   # NCHW, MNIST-shaped
    probs = jax.block_until_ready(network_forward(x, params))
    assert probs.shape == (B, 10)
    row_sums = jnp.sum(probs, axis=1)
    assert bool(jnp.all(jnp.abs(row_sums - 1.0) < 1e-3))
    ref = _reference(x, params)
    assert bool(jnp.all(jnp.abs(probs - ref) < 2e-2))         # bf16 operands -> loose tol

    # Slightly larger batch: exercises the multi-tile (grid >= 2) path.
    B2 = 32
    x2 = jax.random.normal(jax.random.fold_in(kx, 1), (B2, 1, 28, 28), jnp.float32)
    probs2 = jax.block_until_ready(network_forward(x2, params))
    assert probs2.shape == (B2, 10)
    assert bool(jnp.all(jnp.abs(jnp.sum(probs2, axis=1) - 1.0) < 1e-3))

    print("KERNEL_OK")
</pallas_src>

<mosaic_0001>
module attributes {stable_mosaic.version = 11 : i64} {
  func.func @mlp_kernel(%arg0: i32, %arg1: memref<8x784xf32, #tpu.memory_space<vmem>>, %arg2: memref<784x256xbf16, #tpu.memory_space<vmem>>, %arg3: memref<1x256xf32, #tpu.memory_space<vmem>>, %arg4: memref<256x128xbf16, #tpu.memory_space<vmem>>, %arg5: memref<1x128xf32, #tpu.memory_space<vmem>>, %arg6: memref<128x128xbf16, #tpu.memory_space<vmem>>, %arg7: memref<1x128xf32, #tpu.memory_space<vmem>>, %arg8: memref<128x128xbf16, #tpu.memory_space<vmem>>, %arg9: memref<1x128xf32, #tpu.memory_space<vmem>>, %arg10: memref<8x128xf32, #tpu.memory_space<vmem>>) attributes {dimension_semantics = [#tpu.dimension_semantics<parallel>], iteration_bounds = array<i64: 1>, scalar_prefetch = 0 : i64, scratch_operands = 0 : i64, tpu.core_type = #tpu.core_type<tc>, window_params = [{transform_indices = @transform_0, window_bounds = array<i64: 8, 784>}, {pipeline_mode = #tpu.pipeline_mode<synchronous>, transform_indices = @transform_1, window_bounds = array<i64: 784, 256>}, {pipeline_mode = #tpu.pipeline_mode<synchronous>, transform_indices = @transform_2, window_bounds = array<i64: 1, 256>}, {pipeline_mode = #tpu.pipeline_mode<synchronous>, transform_indices = @transform_3, window_bounds = array<i64: 256, 128>}, {pipeline_mode = #tpu.pipeline_mode<synchronous>, transform_indices = @transform_4, window_bounds = array<i64: 1, 128>}, {pipeline_mode = #tpu.pipeline_mode<synchronous>, transform_indices = @transform_5, window_bounds = array<i64: 128, 128>}, {pipeline_mode = #tpu.pipeline_mode<synchronous>, transform_indices = @transform_6, window_bounds = array<i64: 1, 128>}, {pipeline_mode = #tpu.pipeline_mode<synchronous>, transform_indices = @transform_7, window_bounds = array<i64: 128, 128>}, {pipeline_mode = #tpu.pipeline_mode<synchronous>, transform_indices = @transform_8, window_bounds = array<i64: 1, 128>}, {transform_indices = @transform_9, window_bounds = array<i64: 8, 128>}]} {
    %c0 = arith.constant 0 : index
    %c0_0 = arith.constant 0 : index
    %0 = vector.load %arg1[%c0, %c0_0] : memref<8x784xf32, #tpu.memory_space<vmem>>, vector<8x784xf32>
    %1 = arith.truncf %0 : vector<8x784xf32> to vector<8x784xbf16>
    %c0_1 = arith.constant 0 : index
    %c0_2 = arith.constant 0 : index
    %2 = vector.load %arg2[%c0_1, %c0_2] : memref<784x256xbf16, #tpu.memory_space<vmem>>, vector<784x256xbf16>
    %cst = arith.constant dense<0.000000e+00> : vector<8x256xf32>
    %3 = tpu.matmul %1, %2, %cst {dimension_numbers = #tpu.dot_dimension_numbers<[1], [0], [0], [1], [0, 0, 1, 1], [], []>} : vector<8x784xbf16>, vector<784x256xbf16>, vector<8x256xf32> -> vector<8x256xf32>
    %c0_3 = arith.constant 0 : index
    %c0_4 = arith.constant 0 : index
    %4 = vector.load %arg3[%c0_3, %c0_4] : memref<1x256xf32, #tpu.memory_space<vmem>>, vector<1x256xf32>
    %5 = vector.broadcast %4 : vector<1x256xf32> to vector<8x256xf32>
    %6 = arith.addf %3, %5 : vector<8x256xf32>
    %cst_5 = arith.constant 0.000000e+00 : f32
    %7 = vector.broadcast %cst_5 : f32 to vector<8x256xf32>
    %8 = arith.maximumf %6, %7 : vector<8x256xf32>
    %9 = arith.truncf %8 : vector<8x256xf32> to vector<8x256xbf16>
    %c0_6 = arith.constant 0 : index
    %c0_7 = arith.constant 0 : index
    %10 = vector.load %arg4[%c0_6, %c0_7] : memref<256x128xbf16, #tpu.memory_space<vmem>>, vector<256x128xbf16>
    %cst_8 = arith.constant dense<0.000000e+00> : vector<8x128xf32>
    %11 = tpu.matmul %9, %10, %cst_8 {dimension_numbers = #tpu.dot_dimension_numbers<[1], [0], [0], [1], [0, 0, 1, 1], [], []>} : vector<8x256xbf16>, vector<256x128xbf16>, vector<8x128xf32> -> vector<8x128xf32>
    %c0_9 = arith.constant 0 : index
    %c0_10 = arith.constant 0 : index
    %12 = vector.load %arg5[%c0_9, %c0_10] : memref<1x128xf32, #tpu.memory_space<vmem>>, vector<1x128xf32>
    %13 = vector.broadcast %12 : vector<1x128xf32> to vector<8x128xf32>
    %14 = arith.addf %11, %13 : vector<8x128xf32>
    %cst_11 = arith.constant 0.000000e+00 : f32
    %15 = vector.broadcast %cst_11 : f32 to vector<8x128xf32>
    %16 = arith.maximumf %14, %15 : vector<8x128xf32>
    %17 = arith.truncf %16 : vector<8x128xf32> to vector<8x128xbf16>
    %c0_12 = arith.constant 0 : index
    %c0_13 = arith.constant 0 : index
    %18 = vector.load %arg6[%c0_12, %c0_13] : memref<128x128xbf16, #tpu.memory_space<vmem>>, vector<128x128xbf16>
    %cst_14 = arith.constant dense<0.000000e+00> : vector<8x128xf32>
    %19 = tpu.matmul %17, %18, %cst_14 {dimension_numbers = #tpu.dot_dimension_numbers<[1], [0], [0], [1], [0, 0, 1, 1], [], []>} : vector<8x128xbf16>, vector<128x128xbf16>, vector<8x128xf32> -> vector<8x128xf32>
    %c0_15 = arith.constant 0 : index
    %c0_16 = arith.constant 0 : index
    %20 = vector.load %arg7[%c0_15, %c0_16] : memref<1x128xf32, #tpu.memory_space<vmem>>, vector<1x128xf32>
    %21 = vector.broadcast %20 : vector<1x128xf32> to vector<8x128xf32>
    %22 = arith.addf %19, %21 : vector<8x128xf32>
    %cst_17 = arith.constant 0.000000e+00 : f32
    %23 = vector.broadcast %cst_17 : f32 to vector<8x128xf32>
    %24 = arith.maximumf %22, %23 : vector<8x128xf32>
    %25 = arith.truncf %24 : vector<8x128xf32> to vector<8x128xbf16>
    %c0_18 = arith.constant 0 : index
    %c0_19 = arith.constant 0 : index
    %26 = vector.load %arg8[%c0_18, %c0_19] : memref<128x128xbf16, #tpu.memory_space<vmem>>, vector<128x128xbf16>
    %cst_20 = arith.constant dense<0.000000e+00> : vector<8x128xf32>
    %27 = tpu.matmul %25, %26, %cst_20 {dimension_numbers = #tpu.dot_dimension_numbers<[1], [0], [0], [1], [0, 0, 1, 1], [], []>} : vector<8x128xbf16>, vector<128x128xbf16>, vector<8x128xf32> -> vector<8x128xf32>
    %c0_21 = arith.constant 0 : index
    %c0_22 = arith.constant 0 : index
    %28 = vector.load %arg9[%c0_21, %c0_22] : memref<1x128xf32, #tpu.memory_space<vmem>>, vector<1x128xf32>
    %29 = vector.broadcast %28 : vector<1x128xf32> to vector<8x128xf32>
    %30 = arith.addf %27, %29 : vector<8x128xf32>
    %cst_23 = arith.constant dense<0xFF800000> : vector<8xf32>
    %31 = vector.multi_reduction <maximumf>, %30, %cst_23 [1] : vector<8x128xf32> to vector<8xf32>
    %32 = vector.shape_cast %31 : vector<8xf32> to vector<8x1xf32>
    %33 = vector.broadcast %32 : vector<8x1xf32> to vector<8x128xf32>
    %34 = arith.subf %30, %33 : vector<8x128xf32>
    %35 = math.exp %34 : vector<8x128xf32>
    %cst_24 = arith.constant dense<0.000000e+00> : vector<8xf32>
    %36 = vector.multi_reduction <add>, %35, %cst_24 [1] : vector<8x128xf32> to vector<8xf32>
    %37 = vector.shape_cast %36 : vector<8xf32> to vector<8x1xf32>
    %38 = vector.broadcast %37 : vector<8x1xf32> to vector<8x128xf32>
    %39 = arith.divf %35, %38 : vector<8x128xf32>
    %c0_25 = arith.constant 0 : index
    %c0_26 = arith.constant 0 : index
    %40 = vector.load %arg10[%c0_25, %c0_26] : memref<8x128xf32, #tpu.memory_space<vmem>>, vector<8x128xf32>
    tpu.vector_store %arg10[%c0_25, %c0_26], %39 {strides = array<i32>} : memref<8x128xf32, #tpu.memory_space<vmem>>, vector<8x128xf32>,
    return
  }
  func.func @transform_0(%arg0: i32) -> (i32, i32) {
    %c0_i32 = arith.constant 0 : i32
    %c0_i32_0 = arith.constant 0 : i32
    return %arg0, %c0_i32 : i32, i32
  }
  func.func @transform_1(%arg0: i32) -> (i32, i32) {
    %c0_i32 = arith.constant 0 : i32
    %c0_i32_0 = arith.constant 0 : i32
    %c0_i32_1 = arith.constant 0 : i32
    return %c0_i32, %c0_i32_0 : i32, i32
  }
  func.func @transform_2(%arg0: i32) -> (i32, i32) {
    %c0_i32 = arith.constant 0 : i32
    %c0_i32_0 = arith.constant 0 : i32
    %c0_i32_1 = arith.constant 0 : i32
    return %c0_i32, %c0_i32_0 : i32, i32
  }
  func.func @transform_3(%arg0: i32) -> (i32, i32) {
    %c0_i32 = arith.constant 0 : i32
    %c0_i32_0 = arith.constant 0 : i32
    %c0_i32_1 = arith.constant 0 : i32
    return %c0_i32, %c0_i32_0 : i32, i32
  }
  func.func @transform_4(%arg0: i32) -> (i32, i32) {
    %c0_i32 = arith.constant 0 : i32
    %c0_i32_0 = arith.constant 0 : i32
    %c0_i32_1 = arith.constant 0 : i32
    return %c0_i32, %c0_i32_0 : i32, i32
  }
  func.func @transform_5(%arg0: i32) -> (i32, i32) {
    %c0_i32 = arith.constant 0 : i32
    %c0_i32_0 = arith.constant 0 : i32
    %c0_i32_1 = arith.constant 0 : i32
    return %c0_i32, %c0_i32_0 : i32, i32
  }
  func.func @transform_6(%arg0: i32) -> (i32, i32) {
    %c0_i32 = arith.constant 0 : i32
    %c0_i32_0 = arith.constant 0 : i32
    %c0_i32_1 = arith.constant 0 : i32
    return %c0_i32, %c0_i32_0 : i32, i32
  }
  func.func @transform_7(%arg0: i32) -> (i32, i32) {
    %c0_i32 = arith.constant 0 : i32
    %c0_i32_0 = arith.constant 0 : i32
    %c0_i32_1 = arith.constant 0 : i32
    return %c0_i32, %c0_i32_0 : i32, i32
  }
  func.func @transform_8(%arg0: i32) -> (i32, i32) {
    %c0_i32 = arith.constant 0 : i32
    %c0_i32_0 = arith.constant 0 : i32
    %c0_i32_1 = arith.constant 0 : i32
    return %c0_i32, %c0_i32_0 : i32, i32
  }
  func.func @transform_9(%arg0: i32) -> (i32, i32) {
    %c0_i32 = arith.constant 0 : i32
    %c0_i32_0 = arith.constant 0 : i32
    return %arg0, %c0_i32 : i32, i32
  }
}

</mosaic_0001>

<bundles_post_ra>
// kernel: tpu_custom_call.1
= control target key start
LH: loop header
LB: loop body
LE: loop exit
PB: predicated region body
PF: predicated region fallthrough
CT: control target
= control target key end

     0   :  { %14 = vsyncpa [#allocation3], 0  ;;  %s2050_s0 = inlined_call_operand.hbm [shape: f32[8,784], index: 0, kind: input, shape index: {}]   ;;  %s2051_s1 = inlined_call_operand.hbm [shape: bf16[784,256], index: 1, kind: input, shape index: {}]   ;;  %s2052_s2 = inlined_call_operand.vmem [shape: f32[1,256], index: 2, kind: input, shape index: {}]   ;;  %s2053_s3 = inlined_call_operand.hbm [shape: bf16[256,128], index: 3, kind: input, shape index: {}]   ;;  %s2054_s4 = inlined_call_operand.vmem [shape: f32[1,128], index: 4, kind: input, shape index: {}]   ;;  %s2055_s5 = inlined_call_operand.hbm [shape: bf16[128,128], index: 5, kind: input, shape index: {}]   ;;  %s2056_s6 = inlined_call_operand.vmem [shape: f32[1,128], index: 6, kind: input, shape index: {}]   ;;  %s2057_s7 = inlined_call_operand.hbm [shape: bf16[128,128], index: 7, kind: input, shape index: {}]   ;;  %s2058_s8 = inlined_call_operand.vmem [shape: f32[1,128], index: 8, kind: input, shape index: {}]   ;;  %s2059_s9 = inlined_call_operand.hbm [shape: f32[8,128], index: 9, kind: output, shape index: {}]  }
   0x1   :  { %15 = vsyncpa [#allocation6], 0 }
   0x2   :  { %16 = vsyncpa [#allocation9], 0 }
   0x3   :  { %17 = vsyncpa [#allocation4], 0  ;;  %s1876_s30 = smov [#allocation5]   ;;  %s1736_s13 = scalar_lea.hbm %s2051_s1, 12544 }
   0x4   :  { %s33_s10 = sshll.u32 %s1876_s30, 4  ;;  %p1737_p0 = scmp.ne.s32.totalorder %s2051_s1, %s1736_s13  ;;  %s34_s10 = int_to_ptr.vmem [resolvable:$true] %s33_s10 }
   0x5   :  { %p1740_p1 = scmp.lt.u32.totalorder %s1736_s13, %s2051_s1 }
   0x7   :  { %p1742_p2 = pnand %p1740_p1, %p1737_p0 }
   0x9   :  { %1745 = shalt.err (!%p1742_p2)
}
   0xa   :  { %s1746_s18 = scalar_lea.vmem %s34_s10, 12544  ;;  %p1751_p4 = scmp.lt.s32.totalorder %s34_s10, %s34_s10 }
   0xb   :  { %p1747_p3 = scmp.ne.s32.totalorder %s34_s10, %s1746_s18  ;;  %p1752_p5 = scmp.lt.s32.totalorder %s1746_s18, %s1746_s18 }
   0xd   :  { %p1753_p6 = por %p1752_p5, %p1751_p4 }
   0xf   :  { %p1754_p7 = pnand %p1753_p6, %p1747_p3 }
  0x11   :  { %1757 = shalt.err (!%p1754_p7)
}
  0x12   :  { %s1877_s19 = smov 128   ;;  %s1878_s20 = smov 8  }
  0x13   :  { %39 = dma.hbm_to_vmem [thread:$0]  %s2051_s1, 12544, %s34_s10, [#allocation6], %s1877_s19, %s1877_s19, %s1878_s20  }
  0x14   :  { %s1879_s23 = smov [#allocation8]   ;;  %s1880_s25 = smov [#allocation2]  }
  0x15   :  { %s61_s24 = sshll.u32 %s1879_s23, 4  ;;  %s24_s26 = sshll.u32 %s1880_s25, 4  ;;  %s62_s24 = int_to_ptr.vmem [resolvable:$true] %s61_s24  ;;  %s25_s26 = int_to_ptr.vmem [resolvable:$true] %s24_s26 }
  0x16   :  { %s1758_s29 = scalar_lea.hbm %s2055_s5, 1024 }
  0x17   :  { %p1759_p8 = scmp.ne.s32.totalorder %s2055_s5, %s1758_s29  ;;  %p1762_p9 = scmp.lt.u32.totalorder %s1758_s29, %s2055_s5 }
  0x19   :  { %p1764_p10 = pnand %p1762_p9, %p1759_p8 }
  0x1b   :  { %1767 = shalt.err (!%p1764_p10)
}
  0x1c   :  { %s1768_s1 = scalar_lea.vmem %s62_s24, 1024  ;;  %p1773_p12 = scmp.lt.s32.totalorder %s62_s24, %s62_s24 }
  0x1d   :  { %p1769_p11 = scmp.ne.s32.totalorder %s62_s24, %s1768_s1  ;;  %p1774_p13 = scmp.lt.s32.totalorder %s1768_s1, %s1768_s1 }
  0x1f   :  { %p1775_p0 = por %p1774_p13, %p1773_p12 }
  0x21   :  { %p1776_p1 = pnand %p1775_p0, %p1769_p11 }
  0x23   :  { %1779 = shalt.err (!%p1776_p1)
}
  0x24   :  { %s1881_s10 = smov 64   ;;  %s1882_s14 = smov 4  }
  0x25   :  { %67 = dma.hbm_to_vmem [thread:$0]  %s2055_s5, 1024, %s62_s24, [#allocation9], %s1881_s10, %s1881_s10, %s1882_s14  }
  0x26   :  { %s1780_s19 = scalar_lea.hbm %s2050_s0, 896 }
  0x27   :  { %p1781_p2 = scmp.ne.s32.totalorder %s2050_s0, %s1780_s19  ;;  %p1784_p3 = scmp.lt.u32.totalorder %s1780_s19, %s2050_s0 }
  0x29   :  { %p1786_p4 = pnand %p1784_p3, %p1781_p2 }
  0x2b   :  { %1789 = shalt.err (!%p1786_p4)
}
  0x2c   :  { %s1790_s25 = scalar_lea.vmem %s25_s26, 896  ;;  %p1795_p6 = scmp.lt.s32.totalorder %s25_s26, %s25_s26 }
  0x2d   :  { %p1791_p5 = scmp.ne.s32.totalorder %s25_s26, %s1790_s25  ;;  %p1796_p7 = scmp.lt.s32.totalorder %s1790_s25, %s1790_s25 }
  0x2f   :  { %p1797_p8 = por %p1796_p7, %p1795_p6 }
  0x31   :  { %p1798_p9 = pnand %p1797_p8, %p1791_p5 }
  0x33   :  { %1801 = shalt.err (!%p1798_p9)
}
  0x34   :  { %27 = dma.hbm_to_vmem [thread:$0]  %s2050_s0, 896, %s25_s26, [#allocation3]  }
  0x35   :  { %s1883_s27 = smov [#allocation7]   ;;  %s1884_s29 = smov [#allocation10]  }
  0x36   :  { %s47_s28 = sshll.u32 %s1883_s27, 4  ;;  %s75_s30 = sshll.u32 %s1884_s29, 4  ;;  %s48_s28 = int_to_ptr.vmem [resolvable:$true] %s47_s28  ;;  %s76_s30 = int_to_ptr.vmem [resolvable:$true] %s75_s30 }
  0x37   :  { %s1802_s13 = scalar_lea.hbm %s2053_s3, 2048 }
  0x38   :  { %p1803_p10 = scmp.ne.s32.totalorder %s2053_s3, %s1802_s13  ;;  %p1806_p11 = scmp.lt.u32.totalorder %s1802_s13, %s2053_s3 }
  0x3a   :  { %p1808_p12 = pnand %p1806_p11, %p1803_p10 }
  0x3c   :  { %1811 = shalt.err (!%p1808_p12)
}
  0x3d   :  { %s1812_s0 = scalar_lea.vmem %s48_s28, 2048  ;;  %p1817_p0 = scmp.lt.s32.totalorder %s48_s28, %s48_s28 }
  0x3e   :  { %p1813_p13 = scmp.ne.s32.totalorder %s48_s28, %s1812_s0  ;;  %p1818_p1 = scmp.lt.s32.totalorder %s1812_s0, %s1812_s0 }
  0x40   :  { %p1819_p2 = por %p1818_p1, %p1817_p0 }
  0x42   :  { %p1820_p3 = pnand %p1819_p2, %p1813_p13 }
  0x44   :  { %1823 = shalt.err (!%p1820_p3)
}
  0x45   :  { %53 = dma.hbm_to_vmem [thread:$0]  %s2053_s3, 2048, %s48_s28, [#allocation6], %s1881_s10, %s1881_s10, %s1882_s14  }
  0x46   :  { %s1824_s21 = scalar_lea.hbm %s2057_s7, 1024 }
  0x47   :  { %p1825_p4 = scmp.ne.s32.totalorder %s2057_s7, %s1824_s21  ;;  %p1828_p5 = scmp.lt.u32.totalorder %s1824_s21, %s2057_s7 }
  0x49   :  { %p1830_p6 = pnand %p1828_p5, %p1825_p4 }
  0x4b   :  { %1833 = shalt.err (!%p1830_p6)
}
  0x4c   :  { %s1834_s24 = scalar_lea.vmem %s76_s30, 1024  ;;  %p1839_p8 = scmp.lt.s32.totalorder %s76_s30, %s76_s30 }
  0x4d   :  { %p1835_p7 = scmp.ne.s32.totalorder %s76_s30, %s1834_s24  ;;  %p1840_p9 = scmp.lt.s32.totalorder %s1834_s24, %s1834_s24 }
  0x4f   :  { %p1841_p10 = por %p1840_p9, %p1839_p8 }
  0x51   :  { %p1842_p11 = pnand %p1841_p10, %p1835_p7 }
  0x53   :  { %1845 = shalt.err (!%p1842_p11)
}
  0x54   :  { %81 = dma.hbm_to_vmem [thread:$0]  %s2057_s7, 1024, %s76_s30, [#allocation9], %s1881_s10, %s1881_s10, %s1882_s14  }
  0x55   :  { %1868 = dma.done.wait [#allocation3], 896  }
  0x56   :  { %1869 = vsyncadd [#allocation3], 4294966400 }
  0x57   :  { %1870 = dma.done.wait [#allocation6], 14592  }
  0x58   :  { %1871 = vsyncadd [#allocation6], 4294952704 }
  0x59   :  { %1872 = dma.done.wait [#allocation9], 2048  }
  0x5a   :  { %1873 = vsyncadd [#allocation9], 4294965248  ;;  %v1553_v0 = vld [vmem:[#allocation5 + $0x104] ss:$8 sps:$4 sm:$0xff]   ;;  %v1555_v1 = vld [vmem:[#allocation5 + $0x100] ss:$8 sps:$4 sm:$0xff]  }
  0x5b   :  { %759 = vmatprep.subr.bf16.mxu0 %v1553_v0  ;;  %v1556_v2 = vld [vmem:[#allocation5 + $0x114] ss:$8 sps:$4 sm:$0xff]   ;;  %v1558_v3 = vld [vmem:[#allocation5 + $0x110] ss:$8 sps:$4 sm:$0xff]   ;;  %v1559_v4 = vld [vmem:[#allocation5 + $0x124] ss:$8 sps:$4 sm:$0xff]  }
  0x5c   :  { %760 = vmatpush1.bf16.msra.mxu0 %v1555_v1  ;;  %v1561_v5 = vld [vmem:[#allocation5 + $0x120] ss:$8 sps:$4 sm:$0xff]   ;;  %v1562_v6 = vld [vmem:[#allocation5 + $0x134] ss:$8 sps:$4 sm:$0xff]   ;;  %v1564_v7 = vld [vmem:[#allocation5 + $0x130] ss:$8 sps:$4 sm:$0xff]  }
  0x5d   :  { %761 = vmatprep.subr.bf16.mxu0 %v1556_v2  ;;  %v1565_v8 = vld [vmem:[#allocation5 + $0x144] ss:$8 sps:$4 sm:$0xff]   ;;  %v1567_v9 = vld [vmem:[#allocation5 + $0x140] ss:$8 sps:$4 sm:$0xff]   ;;  %v1568_v10 = vld [vmem:[#allocation5 + $0x154] ss:$8 sps:$4 sm:$0xff]  }
  0x5e   :  { %v1570_v11 = vld [vmem:[#allocation5 + $0x150] ss:$8 sps:$4 sm:$0xff]   ;;  %v1571_v12 = vld [vmem:[#allocation5 + $0x164] ss:$8 sps:$4 sm:$0xff]   ;;  %v1573_v15 = vld [vmem:[#allocation5 + $0x160] ss:$8 sps:$4 sm:$0xff]  }
  0x5f   :  { %v103_v13 = vld [vmem:[#allocation2 + $0x18] sm:$0xff]  ;;  %v1574_v16 = vld [vmem:[#allocation5 + $0x174] ss:$8 sps:$4 sm:$0xff]   ;;  %v1576_v18 = vld [vmem:[#allocation5 + $0x170] ss:$8 sps:$4 sm:$0xff]   ;;  %vm714_vm0 = vcmask 130048  }
  0x60   :  { %762 = vmatpush1.bf16.msra.mxu0 %v1558_v3  ;;  %v110_v14 = vpack.c.bf16 %v103_v13, %v103_v13  ;;  %v1607_v17 = vld [vmem:[#allocation5 + $0x4] ss:$8 sps:$4 sm:$0xff]   ;;  %v1612_v20 = vld [vmem:[#allocation5] ss:$8 sps:$4 sm:$0xff]   ;;  %v1613_v21 = vld [vmem:[#allocation5 + $0x14] ss:$8 sps:$4 sm:$0xff]  }
  0x61   :  { %763 = vmatprep.subr.bf16.mxu0 %v1559_v4  ;;  %v1577_v19 = vld [vmem:[#allocation5 + $0x184] ss:$8 sps:$4 sm:$0xff]   ;;  %718 = vmatprep.subr.bf16.mxu1 %v1607_v17  ;;  %v1618_v22 = vld [vmem:[#allocation5 + $0x10] ss:$8 sps:$4 sm:$0xff]   ;;  %v1579_v24 = vld [vmem:[#allocation5 + $0x180] ss:$8 sps:$4 sm:$0xff]  }
  0x62   :  { %791 = vmatprep.mubr.bf16.mxu0 %v110_v14  ;;  %719 = vmatpush1.bf16.msra.mxu1 %v1612_v20  ;;  %v1619_v23 = vld [vmem:[#allocation5 + $0x24] ss:$8 sps:$4 sm:$0xff]   ;;  %v1580_v25 = vld [vmem:[#allocation5 + $0x194] ss:$8 sps:$4 sm:$0xff]   ;;  %v1624_v26 = vld [vmem:[#allocation5 + $0x20] ss:$8 sps:$4 sm:$0xff]  }
  0x63   :  { %720 = vmatprep.subr.bf16.mxu1 %v1613_v21  ;;  %v1625_v27 = vld [vmem:[#allocation5 + $0x34] ss:$8 sps:$4 sm:$0xff]   ;;  %v1582_v28 = vld [vmem:[#allocation5 + $0x190] ss:$8 sps:$4 sm:$0xff]   ;;  %v1583_v29 = vld [vmem:[#allocation5 + $0x1a4] ss:$8 sps:$4 sm:$0xff]  }
  0x64   :  { %764 = vmatpush1.bf16.msra.mxu0 %v1561_v5  ;;  %v1630_v30 = vld [vmem:[#allocation5 + $0x30] ss:$8 sps:$4 sm:$0xff]   ;;  %v1631_v31 = vld [vmem:[#allocation5 + $0x44] ss:$8 sps:$4 sm:$0xff]   ;;  %v1585_v32 = vld [vmem:[#allocation5 + $0x1a0] ss:$8 sps:$4 sm:$0xff]  }
  0x65   :  { %765 = vmatprep.subr.bf16.mxu0 %v1562_v6  ;;  %v1586_v33 = vld [vmem:[#allocation5 + $0x1b4] ss:$8 sps:$4 sm:$0xff]   ;;  %v1636_v34 = vld [vmem:[#allocation5 + $0x40] ss:$8 sps:$4 sm:$0xff]   ;;  %v1588_v36 = vld [vmem:[#allocation5 + $0x1b0] ss:$8 sps:$4 sm:$0xff]  }
  0x66   :  { %721 = vmatpush1.bf16.msra.mxu1 %v1618_v22  ;;  %v1637_v35 = vld [vmem:[#allocation5 + $0x54] ss:$8 sps:$4 sm:$0xff]   ;;  %v1589_v37 = vld [vmem:[#allocation5 + $0x1c4] ss:$8 sps:$4 sm:$0xff]   ;;  %v1642_v38 = vld [vmem:[#allocation5 + $0x50] ss:$8 sps:$4 sm:$0xff]  }
  0x67   :  { %722 = vmatprep.subr.bf16.mxu1 %v1619_v23  ;;  %v1643_v39 = vld [vmem:[#allocation5 + $0x64] ss:$8 sps:$4 sm:$0xff]   ;;  %v1591_v40 = vld [vmem:[#allocation5 + $0x1c0] ss:$8 sps:$4 sm:$0xff]   ;;  %v1592_v41 = vld [vmem:[#allocation5 + $0x1d4] ss:$8 sps:$4 sm:$0xff]  }
  0x68   :  { %766 = vmatpush1.bf16.msra.mxu0 %v1564_v7  ;;  %v1648_v42 = vld [vmem:[#allocation5 + $0x60] ss:$8 sps:$4 sm:$0xff]   ;;  %v1649_v43 = vld [vmem:[#allocation5 + $0x74] ss:$8 sps:$4 sm:$0xff]   ;;  %v1594_v44 = vld [vmem:[#allocation5 + $0x1d0] ss:$8 sps:$4 sm:$0xff]  }
  0x69   :  { %767 = vmatprep.subr.bf16.mxu0 %v1565_v8  ;;  %v1595_v45 = vld [vmem:[#allocation5 + $0x1e4] ss:$8 sps:$4 sm:$0xff]   ;;  %v1654_v46 = vld [vmem:[#allocation5 + $0x70] ss:$8 sps:$4 sm:$0xff]   ;;  %v1597_v48 = vld [vmem:[#allocation5 + $0x1e0] ss:$8 sps:$4 sm:$0xff]  }
  0x6a   :  { %723 = vmatpush1.bf16.msra.mxu1 %v1624_v26  ;;  %v1655_v47 = vld [vmem:[#allocation5 + $0x84] ss:$8 sps:$4 sm:$0xff]   ;;  %v1598_v49 = vld [vmem:[#allocation5 + $0x1f4] ss:$8 sps:$4 sm:$0xff]   ;;  %v1660_v50 = vld [vmem:[#allocation5 + $0x80] ss:$8 sps:$4 sm:$0xff]  }
  0x6b   :  { %724 = vmatprep.subr.bf16.mxu1 %v1625_v27  ;;  %v1600_v51 = vld [vmem:[#allocation5 + $0x1f0] ss:$8 sps:$4 sm:$0xff]   ;;  %v1661_v52 = vld [vmem:[#allocation5 + $0x94] ss:$8 sps:$4 sm:$0xff]   ;;  %v1603_v54 = vld [vmem:[#allocation5 + $0x204] ss:$8 sps:$4 sm:$0xff]  }
  0x6c   :  { %768 = vmatpush1.bf16.msra.mxu0 %v1567_v9  ;;  %v102_v53 = vld [vmem:[#allocation2 + $0x10] sm:$0xff]  ;;  %v1667_v56 = vld [vmem:[#allocation5 + $0xa4] ss:$8 sps:$4 sm:$0xff]   ;;  %v105_v58 = vld [vmem:[#allocation2 + $0x28] sm:$0xff]  ;;  %vm1887_vm1 = vmmov 0  }
  0x6d   :  { %769 = vmatprep.subr.bf16.mxu0 %v1568_v10  ;;  %v1666_v55 = vld [vmem:[#allocation5 + $0x90] ss:$8 sps:$4 sm:$0xff]   ;;  %v109_v57 = vpack.c.bf16 %v102_v53, %v102_v53  ;;  %v1601_v59 = vld [vmem:[#allocation5 + $0x200] ss:$8 sps:$4 sm:$0xff]   ;;  %v112_v60 = vpack.c.bf16 %v105_v58, %v105_v58  ;;  %v1606_v61 = vld [vmem:[#allocation5 + $0x214] ss:$8 sps:$4 sm:$0xff]  }
  0x6e   :  { %725 = vmatpush1.bf16.msra.mxu1 %v1630_v30  ;;  %v1672_v62 = vld [vmem:[#allocation5 + $0xa0] ss:$8 sps:$4 sm:$0xff]   ;;  %v1673_v63 = vld [vmem:[#allocation5 + $0xb4] ss:$8 sps:$4 sm:$0xff]   ;;  %v1604_v1 = vld [vmem:[#allocation5 + $0x210] ss:$8 sps:$4 sm:$0xff]  }
  0x6f   :  { %726 = vmatprep.subr.bf16.mxu1 %v1631_v31  ;;  %v101_v0 = vld [vmem:[#allocation2 + $0x8] sm:$0xff]  ;;  %v1611_v3 = vld [vmem:[#allocation5 + $0x224] ss:$8 sps:$4 sm:$0xff]   ;;  %v1609_v6 = vld [vmem:[#allocation5 + $0x220] ss:$8 sps:$4 sm:$0xff]  }
  0x70   :  { %770 = vmatpush1.bf16.msra.mxu0 %v1570_v11  ;;  %v108_v2 = vpack.c.bf16 %v101_v0, %v101_v0  ;;  %v1678_v4 = vld [vmem:[#allocation5 + $0xb0] ss:$8 sps:$4 sm:$0xff]   ;;  %v1679_v5 = vld [vmem:[#allocation5 + $0xc4] ss:$8 sps:$4 sm:$0xff]   ;;  %v1617_v7 = vld [vmem:[#allocation5 + $0x234] ss:$8 sps:$4 sm:$0xff]  }
  0x71   :  { %771 = vmatprep.subr.bf16.mxu0 %v1571_v12  ;;  %v1684_v8 = vld [vmem:[#allocation5 + $0xc0] ss:$8 sps:$4 sm:$0xff]   ;;  %v1685_v9 = vld [vmem:[#allocation5 + $0xd4] ss:$8 sps:$4 sm:$0xff]   ;;  %v1615_v10 = vld [vmem:[#allocation5 + $0x230] ss:$8 sps:$4 sm:$0xff]  }
  0x72   :  { %727 = vmatpush1.bf16.msra.mxu1 %v1636_v34  ;;  %750 = vmatprep.mubr.bf16.mxu1 %v108_v2  ;;  %v1623_v11 = vld [vmem:[#allocation5 + $0x244] ss:$8 sps:$4 sm:$0xff]   ;;  %v1621_v12 = vld [vmem:[#allocation5 + $0x240] ss:$8 sps:$4 sm:$0xff]   ;;  %v1690_v13 = vld [vmem:[#allocation5 + $0xd0] ss:$8 sps:$4 sm:$0xff]  }
  0x73   :  { %728 = vmatprep.subr.bf16.mxu1 %v1637_v35  ;;  %v1691_v14 = vld [vmem:[#allocation5 + $0xe4] ss:$8 sps:$4 sm:$0xff]   ;;  %v1697_v17 = vld [vmem:[#allocation5 + $0xf4] ss:$8 sps:$4 sm:$0xff]   ;;  %v1699_v20 = vld [vmem:[#allocation5 + $0xf0] ss:$8 sps:$4 sm:$0xff]  }
  0x74   :  { %772 = vmatpush1.bf16.msra.mxu0 %v1573_v15  ;;  %v1629_v15 = vld [vmem:[#allocation5 + $0x254] ss:$8 sps:$4 sm:$0xff]   ;;  %v100_v21 = vld [vmem:[#allocation2] sm:$0xff]  ;;  %v1704_v31 = vld [vmem:[#allocation7 + $0x50] sm:$0xff]  }
  0x75   :  { %773 = vmatprep.subr.bf16.mxu0 %v1574_v16  ;;  %v1696_v16 = vld [vmem:[#allocation5 + $0xe0] ss:$8 sps:$4 sm:$0xff]   ;;  %v1700_v22 = vld [vmem:[#allocation7 + $0x40] sm:$0xff]   ;;  %v107_v26 = vpack.c.bf16 %v100_v21, %v100_v21  ;;  %v1702_v27 = vld [vmem:[#allocation7 + $0x48] sm:$0xff]  }
  0x76   :  { %729 = vmatpush1.bf16.msra.mxu1 %v1642_v38  ;;  %v1633_v23 = vld [vmem:[#allocation5 + $0x260] ss:$8 sps:$4 sm:$0xff]   ;;  %v1703_v30 = vld [vmem:[#allocation7 + $0x8] sm:$0xff]   ;;  %v1695_v53 = vld [vmem:[#allocation5 + $0x304] ss:$8 sps:$4 sm:$0xff]  }
  0x77   :  { %730 = vmatprep.subr.bf16.mxu1 %v1643_v39  ;;  %v1705_v34 = vld [vmem:[#allocation7 + $0x10] sm:$0xff]   ;;  %v1706_v35 = vld [vmem:[#allocation7 + $0x58] sm:$0xff]   ;;  %v1708_v39 = vld [vmem:[#allocation7 + $0x60] sm:$0xff]  }
  0x78   :  { %774 = vmatpush1.bf16.msra.mxu0 %v1576_v18  ;;  %v1627_v18 = vld [vmem:[#allocation5 + $0x250] ss:$8 sps:$4 sm:$0xff]   ;;  %v1707_v38 = vld [vmem:[#allocation7 + $0x18] sm:$0xff]  }
  0x79   :  { %775 = vmatprep.subr.bf16.mxu0 %v1577_v19  ;;  %v1635_v19 = vld [vmem:[#allocation5 + $0x264] ss:$8 sps:$4 sm:$0xff]  }
  0x7a   :  { %731 = vmatpush1.bf16.msra.mxu1 %v1648_v42  ;;  %v1709_v42 = vld [vmem:[#allocation7 + $0x20] sm:$0xff]   ;;  %v1715_v0 = vld [vmem:[#allocation7 + $0x38] sm:$0xff]  }
  0x7b   :  { %732 = vmatprep.subr.bf16.mxu1 %v1649_v43  ;;  %v1663_v43 = vld [vmem:[#allocation5 + $0x2b0] ss:$8 sps:$4 sm:$0xff]  }
  0x7c   :  { %776 = vmatpush1.bf16.msra.mxu0 %v1579_v24  ;;  %v1641_v24 = vld [vmem:[#allocation5 + $0x274] ss:$8 sps:$4 sm:$0xff]  }
  0x7d   :  { %777 = vmatprep.subr.bf16.mxu0 %v1580_v25  ;;  %v1701_v25 = vld [vmem:[#allocation7] sm:$0xff]  }
  0x7e   :  { %733 = vmatpush1.bf16.msra.mxu1 %v1654_v46  ;;  %v1677_v46 = vld [vmem:[#allocation5 + $0x2d4] ss:$8 sps:$4 sm:$0xff]  }
  0x7f   :  { %734 = vmatprep.subr.bf16.mxu1 %v1655_v47  ;;  %v1675_v47 = vld [vmem:[#allocation5 + $0x2d0] ss:$8 sps:$4 sm:$0xff]  }
  0x80   :  { %778 = vmatpush1.bf16.msra.mxu0 %v1582_v28  ;;  %v1639_v28 = vld [vmem:[#allocation5 + $0x270] ss:$8 sps:$4 sm:$0xff]  }
  0x81   :  { %779 = vmatprep.subr.bf16.mxu0 %v1583_v29  ;;  %v1647_v29 = vld [vmem:[#allocation5 + $0x284] ss:$8 sps:$4 sm:$0xff]  }
  0x82   :  { %735 = vmatpush1.bf16.msra.mxu1 %v1660_v50  ;;  %v1689_v50 = vld [vmem:[#allocation5 + $0x2f4] ss:$8 sps:$4 sm:$0xff]  }
  0x83   :  { %736 = vmatprep.subr.bf16.mxu1 %v1661_v52  ;;  %v104_v52 = vld [vmem:[#allocation2 + $0x20] sm:$0xff] }
  0x84   :  { %780 = vmatpush1.bf16.msra.mxu0 %v1585_v32  ;;  %v1645_v32 = vld [vmem:[#allocation5 + $0x280] ss:$8 sps:$4 sm:$0xff]  }
  0x85   :  { %781 = vmatprep.subr.bf16.mxu0 %v1586_v33  ;;  %v1653_v33 = vld [vmem:[#allocation5 + $0x294] ss:$8 sps:$4 sm:$0xff]  }
  0x86   :  { %737 = vmatpush1.bf16.msra.mxu1 %v1666_v55  ;;  %v1693_v55 = vld [vmem:[#allocation5 + $0x300] ss:$8 sps:$4 sm:$0xff]  }
  0x87   :  { %738 = vmatprep.subr.bf16.mxu1 %v1667_v56  ;;  %v1885_v56 = vmov 0  }
  0x88   :  { %782 = vmatpush1.bf16.msra.mxu0 %v1588_v36  ;;  %v1651_v36 = vld [vmem:[#allocation5 + $0x290] ss:$8 sps:$4 sm:$0xff]  }
  0x89   :  { %783 = vmatprep.subr.bf16.mxu0 %v1589_v37  ;;  %v1659_v37 = vld [vmem:[#allocation5 + $0x2a4] ss:$8 sps:$4 sm:$0xff]  }
  0x8a   :  { %739 = vmatpush1.bf16.msra.mxu1 %v1672_v62  ;;  %v1713_v62 = vld [vmem:[#allocation7 + $0x30] sm:$0xff]  }
  0x8b   :  { %740 = vmatprep.subr.bf16.mxu1 %v1673_v63  ;;  %v1714_v63 = vld [vmem:[#allocation7 + $0x78] sm:$0xff]  }
  0x8c   :  { %784 = vmatpush1.bf16.msra.mxu0 %v1591_v40  ;;  %v1657_v40 = vld [vmem:[#allocation5 + $0x2a0] ss:$8 sps:$4 sm:$0xff]  }
  0x8d   :  { %785 = vmatprep.subr.bf16.mxu0 %v1592_v41  ;;  %v1665_v41 = vld [vmem:[#allocation5 + $0x2b4] ss:$8 sps:$4 sm:$0xff]  }
  0x8e   :  { %741 = vmatpush1.bf16.msra.mxu1 %v1678_v4 }
  0x8f   :  { %742 = vmatprep.subr.bf16.mxu1 %v1679_v5 }
  0x90   :  { %786 = vmatpush1.bf16.msra.mxu0 %v1594_v44  ;;  %v1671_v44 = vld [vmem:[#allocation5 + $0x2c4] ss:$8 sps:$4 sm:$0xff]  }
  0x91   :  { %787 = vmatprep.subr.bf16.mxu0 %v1595_v45  ;;  %v1669_v45 = vld [vmem:[#allocation5 + $0x2c0] ss:$8 sps:$4 sm:$0xff]  }
  0x92   :  { %743 = vmatpush1.bf16.msra.mxu1 %v1684_v8 }
  0x93   :  { %744 = vmatprep.subr.bf16.mxu1 %v1685_v9  ;;  %v212_v9 = vld [vmem:[%s2052_s2] sm:$0x3] }
  0x94   :  { %788 = vmatpush1.bf16.msra.mxu0 %v1597_v48  ;;  %v1683_v48 = vld [vmem:[#allocation5 + $0x2e4] ss:$8 sps:$4 sm:$0xff]  }
  0x95   :  { %789 = vmatprep.subr.bf16.mxu0 %v1598_v49  ;;  %v1681_v49 = vld [vmem:[#allocation5 + $0x2e0] ss:$8 sps:$4 sm:$0xff]  }
  0x96   :  { %745 = vmatpush1.bf16.msra.mxu1 %v1690_v13 }
  0x97   :  { %746 = vmatprep.subr.bf16.mxu1 %v1691_v14 }
  0x98   :  { %790 = vmatpush1.bf16.msra.mxu0 %v1600_v51  ;;  %v1687_v51 = vld [vmem:[#allocation5 + $0x2f0] ss:$8 sps:$4 sm:$0xff]  }
  0x99   :  { %800 = vmatprep.subr.bf16.mxu0 %v1603_v54  ;;  %v111_v54 = vpack.c.bf16 %v104_v52, %v104_v52 }
  0x9a   :  { %747 = vmatpush1.bf16.msra.mxu1 %v1696_v16 }
  0x9b   :  { %792 = vmatmul.mubr.bf16.vlgmr.msra.gmra.mrb[0].mxu0 %v109_v57  ;;  %748 = vmatprep.subr.bf16.mxu1 %v1697_v17  ;;  %v106_v57 = vld [vmem:[#allocation2 + $0x30] sm:$0xff] }
  0x9c   :  { %801 = vmatpush1.bf16.msra.mxu0 %v1601_v59  ;;  %832 = vmatprep.mubr.bf16.mxu0 %v112_v60  ;;  %v113_v58 = vpack.c.bf16 %v106_v57, %v106_v57  ;;  %v1710_v59 = vld [vmem:[#allocation7 + $0x68] sm:$0xff]  }
  0x9d   :  { %802 = vmatprep.subr.bf16.mxu0 %v1606_v61  ;;  %v1711_v60 = vld [vmem:[#allocation7 + $0x28] sm:$0xff]   ;;  %v1712_v61 = vld [vmem:[#allocation7 + $0x70] sm:$0xff]  }
  0x9e   :  { %749 = vmatpush1.bf16.msra.mxu1 %v1699_v20 }
  0x9f   :  { %1448 = vmatprep.subr.bf16.mxu1 %v1700_v22 }
  0xa0   :  { %803 = vmatpush1.bf16.msra.mxu0 %v1604_v1  ;;  %v1886_v1 = vmov 0.0  }
  0xa1   :  { %804 = vmatprep.subr.bf16.mxu0 %v1611_v3  ;;  %751 = vmatmul.mubr.bf16.vlgmr.msra.gmra.mrb[0].mxu1 %v107_v26  ;;  %v1717_v26 = vld [vmem:[#allocation8 + $0x8] sm:$0xff]  }
  0xa2   :  { %1449 = vmatpush3.bf16.msra.mxu1 %v1701_v25 }
  0xa3   :  { %1450 = vmatprep.subr.bf16.mxu1 %v1702_v27  ;;  %v1718_v27 = vld [vmem:[#allocation8 + $0x10] sm:$0xff]  }
  0xa4   :  { %805 = vmatpush1.bf16.msra.mxu0 %v1609_v6  ;;  %v214_v6 = vlaneseq }
  0xa5   :  { %806 = vmatprep.subr.bf16.mxu0 %v1617_v7 }
  0xa6   :  { %1451 = vmatpush3.bf16.msra.mxu1 %v1703_v30  ;;  %v215_v7 = vshrl.u32 %v214_v6, 7  ;;  %v1721_v30 = vld [vmem:[#allocation8 + $0x28] sm:$0xff]  }
  0xa7   :  { %1452 = vmatprep.subr.bf16.mxu1 %v1704_v31  ;;  %v1722_v31 = vld [vmem:[#allocation8 + $0x30] sm:$0xff]  }
  0xa8   :  { %807 = vmatpush1.bf16.msra.mxu0 %v1615_v10  ;;  %v216_v8 = vsub.s32 0, %v215_v7  ;;  %v220_v10 = vsub.s32 1, %v215_v7 }
  0xa9   :  { %808 = vmatprep.subr.bf16.mxu0 %v1623_v11 }
  0xaa   :  { %1453 = vmatpush3.bf16.msra.mxu1 %v1705_v34  ;;  %v217_v11 = vrot.slane %v212_v9, %v216_v8  ;;  %v1413_v34 = vld [vmem:[%s2054_s4] ss:$0 sm:$0xff] }
  0xab   :  { %1454 = vmatprep.subr.bf16.mxu1 %v1706_v35 }
  0xac   :  { %809 = vmatpush1.bf16.msra.mxu0 %v1621_v12  ;;  %v221_v12 = vrot.slane %v212_v9, %v220_v10 }
  0xad   :  { %810 = vmatprep.subr.bf16.mxu0 %v1629_v15 }
  0xae   :  { %1455 = vmatpush3.bf16.msra.mxu1 %v1707_v38 }
  0xaf   :  { %1456 = vmatprep.subr.bf16.mxu1 %v1708_v39 }
  0xb0   :  { %811 = vmatpush1.bf16.msra.mxu0 %v1627_v18 }
  0xb1   :  { %812 = vmatprep.subr.bf16.mxu0 %v1635_v19 }
  0xb2   :  { %1457 = vmatpush3.bf16.msra.mxu1 %v1709_v42 }
  0xb3   :  { %1458 = vmatprep.subr.bf16.mxu1 %v1710_v59 }
  0xb4   :  { %813 = vmatpush1.bf16.msra.mxu0 %v1633_v23 }
  0xb5   :  { %814 = vmatprep.subr.bf16.mxu0 %v1641_v24  ;;  %v1716_v24 = vld [vmem:[#allocation8] sm:$0xff]  }
  0xb6   :  { %1459 = vmatpush3.bf16.msra.mxu1 %v1711_v60 }
  0xb7   :  { %1460 = vmatprep.subr.bf16.mxu1 %v1712_v61 }
  0xb8   :  { %815 = vmatpush1.bf16.msra.mxu0 %v1639_v28  ;;  %v1719_v28 = vld [vmem:[#allocation8 + $0x18] sm:$0xff]  }
  0xb9   :  { %816 = vmatprep.subr.bf16.mxu0 %v1647_v29  ;;  %v1720_v29 = vld [vmem:[#allocation8 + $0x20] sm:$0xff]  }
  0xba   :  { %1461 = vmatpush3.bf16.msra.mxu1 %v1713_v62 }
  0xbb   :  { %1462 = vmatprep.subr.bf16.mxu1 %v1714_v63 }
  0xbc   :  { %817 = vmatpush1.bf16.msra.mxu0 %v1645_v32  ;;  %v1723_v32 = vld [vmem:[#allocation8 + $0x38] sm:$0xff]  }
  0xbd   :  { %818 = vmatprep.subr.bf16.mxu0 %v1653_v33 }
  0xbe   :  { %1463 = vmatpush3.bf16.msra.mxu1 %v1715_v0 }
  0xbf   :  { %1488 = vmatprep.subr.bf16.mxu1 %v1886_v1 }
  0xc0   :  { %819 = vmatpush1.bf16.msra.mxu0 %v1651_v36 }
  0xc1   :  { %820 = vmatprep.subr.bf16.mxu0 %v1659_v37 }
  0xc4   :  { %821 = vmatpush1.bf16.msra.mxu0 %v1657_v40 }
  0xc5   :  { %822 = vmatprep.subr.bf16.mxu0 %v1665_v41  ;;  %v1724_v41 = vld [vmem:[#allocation10] sm:$0xff]  }
  0xc8   :  { %823 = vmatpush1.bf16.msra.mxu0 %v1663_v43  ;;  %v1725_v43 = vld [vmem:[#allocation10 + $0x8] sm:$0xff]  }
  0xc9   :  { %824 = vmatprep.subr.bf16.mxu0 %v1671_v44  ;;  %v1726_v44 = vld [vmem:[#allocation10 + $0x10] sm:$0xff]  }
  0xcc   :  { %825 = vmatpush1.bf16.msra.mxu0 %v1669_v45  ;;  %v1727_v45 = vld [vmem:[#allocation10 + $0x18] sm:$0xff]  }
  0xcd   :  { %826 = vmatprep.subr.bf16.mxu0 %v1677_v46  ;;  %v1728_v46 = vld [vmem:[#allocation10 + $0x20] sm:$0xff]  }
  0xd0   :  { %827 = vmatpush1.bf16.msra.mxu0 %v1675_v47  ;;  %v1729_v47 = vld [vmem:[#allocation10 + $0x28] sm:$0xff]  }
  0xd1   :  { %828 = vmatprep.subr.bf16.mxu0 %v1683_v48  ;;  %v1730_v48 = vld [vmem:[#allocation10 + $0x30] sm:$0xff]  }
  0xd4   :  { %829 = vmatpush1.bf16.msra.mxu0 %v1681_v49  ;;  %v1731_v49 = vld [vmem:[#allocation10 + $0x38] sm:$0xff]  }
  0xd5   :  { %830 = vmatprep.subr.bf16.mxu0 %v1689_v50  ;;  %v1430_v50 = vld [vmem:[%s2056_s6] ss:$0 sm:$0xff]  ;;  %s1888_s6 = smov [#allocation11]  }
  0xd6   :  { %s1303_s11 = sshll.u32 %s1888_s6, 4  ;;  %s1304_s11 = int_to_ptr.vmem [resolvable:$true] %s1303_s11 }
  0xd7   :  { %p1851_p13 = scmp.lt.s32.totalorder %s1304_s11, %s1304_s11 }
  0xd8   :  { %831 = vmatpush1.bf16.msra.mxu0 %v1687_v51 }
  0xd9   :  { %841 = vmatprep.subr.bf16.mxu0 %v1695_v53 }
  0xdb   :  { %833 = vmatmul.mubr.bf16.vlgmr.msra.gmra.mrb[0].mxu0 %v111_v54 }
  0xdc   :  { %842 = vmatpush1.bf16.msra.mxu0 %v1693_v55  ;;  %873 = vmatprep.mubr.bf16.mxu0 %v1885_v56 }
  0xe7   :  { %1412 = vmatmul.mubr.msk.bf16.vlgmr.msra.gmra.mrb[0].mxu0 %vm714_vm0, %v113_v58  ;;  %v1439_v58 = vld [vmem:[%s2058_s8] ss:$0 sm:$0xff]  ;;  %s1846_s8 = scalar_lea.vmem %s1304_s11, 128 }
  0xe8   :  { %p1847_p12 = scmp.ne.s32.totalorder %s1304_s11, %s1846_s8  ;;  %p1852_p0 = scmp.lt.s32.totalorder %s1846_s8, %s1846_s8 }
  0xea   :  { %p1853_p1 = por %p1852_p0, %p1851_p13 }
  0xec   :  { %p1854_p2 = pnand %p1853_p1, %p1847_p12 }
 0x174   :  { %v752_v2 = vpop.f32.mrb[0].mxu1 }
 0x175   :  { %v754_v3 = vpop.f32.mrb[1].mxu1  ;;  %v753_v13 = vadd.f32 %v752_v2, %v217_v11 }
 0x176   :  { %v756_v4 = vpop.f32.mrb[2].mxu1  ;;  %v755_v14 = vadd.f32 %v754_v3, %v221_v12 }
 0x177   :  { %v757_v5 = vpop.f32.mrb[3].mxu1 }
 0x1ba   :  { %v875_v15 = vpop.f32.mrb[0].mxu0 }
 0x1bb   :  { %v1529_v16 = vadd.f32 %v875_v15, %v753_v13  ;;  %v877_v17 = vpop.f32.mrb[1].mxu0 }
 0x1bc   :  { %v1531_v18 = vadd.f32 %v877_v17, %v755_v14  ;;  %v879_v19 = vpop.f32.mrb[2].mxu0 }
 0x1bd   :  { %v882_v20 = vmax.f32 %v1529_v16, 0.0  ;;  %v880_v21 = vpop.f32.mrb[3].mxu0 }
 0x1be   :  { %v883_v22 = vmax.f32 %v1531_v18, 0.0 }
 0x1bf   :  { %v884_v25 = vpack.c.bf16 %v882_v20, %v882_v20 }
 0x1c0   :  { %v885_v23 = vpack.c.bf16 %v883_v22, %v883_v22 }
 0x1c2   :  { %1053 = vmatprep.mubr.bf16.mxu1 %v885_v23 }
 0x1c3   :  { %1054 = vmatmul.mubr.bf16.vlgmr.msra.gmra.mrb[4].mxu1 %v884_v25 }
 0x1c4   :  { %1489 = vmatpush3.bf16.msra.mxu1 %v1716_v24  ;;  %1504 = vmatprep.mubr.msk.bf16.mxu1 %vm1887_vm1, %v1886_v1 }
 0x1c5   :  { %1490 = vmatprep.subr.bf16.mxu1 %v1886_v1 }
 0x1c8   :  { %1491 = vmatpush3.bf16.msra.mxu1 %v1717_v26 }
 0x1c9   :  { %1492 = vmatprep.subr.bf16.mxu1 %v1886_v1 }
 0x1cc   :  { %1493 = vmatpush3.bf16.msra.mxu1 %v1718_v27 }
 0x1cd   :  { %1494 = vmatprep.subr.bf16.mxu1 %v1886_v1 }
 0x1d0   :  { %1495 = vmatpush3.bf16.msra.mxu1 %v1719_v28 }
 0x1d1   :  { %1496 = vmatprep.subr.bf16.mxu1 %v1886_v1 }
 0x1d4   :  { %1497 = vmatpush3.bf16.msra.mxu1 %v1720_v29 }
 0x1d5   :  { %1498 = vmatprep.subr.bf16.mxu1 %v1886_v1 }
 0x1d8   :  { %1499 = vmatpush3.bf16.msra.mxu1 %v1721_v30 }
 0x1d9   :  { %1500 = vmatprep.subr.bf16.mxu1 %v1886_v1 }
 0x1dc   :  { %1501 = vmatpush3.bf16.msra.mxu1 %v1722_v31 }
 0x1dd   :  { %1502 = vmatprep.subr.bf16.mxu1 %v1886_v1 }
 0x1e0   :  { %1503 = vmatpush3.bf16.msra.mxu1 %v1723_v32 }
 0x1e1   :  { %1508 = vmatprep.subr.bf16.mxu1 %v1886_v1 }
 0x296   :  { %v1464_v33 = vpop.f32.mrb[4].mxu1 }
 0x297   :  { %v1465_v35 = vpop.f32.mrb[5].mxu1 }
 0x298   :  { %v1466_v36 = vadd.f32 %v1465_v35, %v1464_v33  ;;  %v1467_v37 = vpop.f32.mrb[6].mxu1 }
 0x299   :  { %v1468_v38 = vpop.f32.mrb[7].mxu1 }
 0x29a   :  { %v1056_v39 = vadd.f32 %v1466_v36, %v1413_v34 }
 0x29c   :  { %v1061_v40 = vmax.f32 %v1056_v39, 0.0 }
 0x29e   :  { %v1062_v42 = vpack.c.bf16 %v1061_v40, %v1061_v40 }
 0x2a0   :  { %1505 = vmatmul.mubr.bf16.vlgmr.msra.gmra.mrb[8].mxu1 %v1062_v42 }
 0x2a1   :  { %1509 = vmatpush3.bf16.msra.mxu1 %v1724_v41  ;;  %1524 = vmatprep.mubr.msk.bf16.mxu1 %vm1887_vm1, %v1886_v1 }
 0x2a2   :  { %1510 = vmatprep.subr.bf16.mxu1 %v1886_v1 }
 0x2a5   :  { %1511 = vmatpush3.bf16.msra.mxu1 %v1725_v43 }
 0x2a6   :  { %1512 = vmatprep.subr.bf16.mxu1 %v1886_v1 }
 0x2a9   :  { %1513 = vmatpush3.bf16.msra.mxu1 %v1726_v44 }
 0x2aa   :  { %1514 = vmatprep.subr.bf16.mxu1 %v1886_v1 }
 0x2ad   :  { %1515 = vmatpush3.bf16.msra.mxu1 %v1727_v45 }
 0x2ae   :  { %1516 = vmatprep.subr.bf16.mxu1 %v1886_v1 }
 0x2b1   :  { %1517 = vmatpush3.bf16.msra.mxu1 %v1728_v46 }
 0x2b2   :  { %1518 = vmatprep.subr.bf16.mxu1 %v1886_v1 }
 0x2b5   :  { %1519 = vmatpush3.bf16.msra.mxu1 %v1729_v47 }
 0x2b6   :  { %1520 = vmatprep.subr.bf16.mxu1 %v1886_v1 }
 0x2b9   :  { %1521 = vmatpush3.bf16.msra.mxu1 %v1730_v48 }
 0x2ba   :  { %1522 = vmatprep.subr.bf16.mxu1 %v1886_v1 }
 0x2bd   :  { %1523 = vmatpush3.bf16.msra.mxu1 %v1731_v49 }
 0x373   :  { %v1168_v51 = vpop.f32.mrb[8].mxu1 }
 0x374   :  { %v1169_v52 = vadd.f32 %v1430_v50, %v1168_v51  ;;  %v1506_v53 = vpop.f32.mrb[9].mxu1 }
 0x375   :  { %v1171_v54 = vpop.f32.mrb[10].mxu1 }
 0x376   :  { %v1174_v55 = vmax.f32 %v1169_v52, 0.0  ;;  %v1507_v56 = vpop.f32.mrb[11].mxu1 }
 0x378   :  { %v1175_v57 = vpack.c.bf16 %v1174_v55, %v1174_v55 }
 0x37a   :  { %1525 = vmatmul.mubr.bf16.vlgmr.msra.gmra.mrb[12].mxu1 %v1175_v57 }
 0x44d   :  { %v1281_v59 = vpop.f32.mrb[12].mxu1 }
 0x44e   :  { %v1282_v60 = vadd.f32 %v1439_v58, %v1281_v59  ;;  %v1526_v61 = vpop.f32.mrb[13].mxu1 }
 0x44f   :  { %v1284_v62 = vpop.f32.mrb[14].mxu1 }
 0x450   :  { %1287 = vmax.xlane.f32.xlu0 %v1282_v60  ;;  %v1527_v63 = vpop.f32.mrb[15].mxu1 }
 0x4dd   :  { %v1288_v0 = vpop.xlane.xlu0 %1287 }
 0x4de   :  { %v1289_v1 = vsub.f32 %v1282_v60, %v1288_v0 }
 0x4e0   :  { %v1290_v2 = vmul.f32 1.442695, %v1289_v1 }
 0x4e2   :  { %1732 = vpow2.f32 %v1290_v2 }
 0x4ec   :  { %v1733_v3 = vpop.eup %1732 }
 0x4ed   :  { %1292 = vadd.xlane.f32.xlu0 %v1733_v3 }
 0x57a   :  { %v1293_v4 = vpop.xlane.xlu0 %1292 }
 0x57b   :  { %1734 = vrcp.f32 %v1293_v4 }
 0x585   :  { %v1735_v5 = vpop.eup %1734 }
 0x586   :  { %v1295_v6 = vmul.f32 %v1735_v5, %v1733_v3 }
 0x588   :  { %1296 = vst [vmem:[#allocation11] sm:$0xff] %v1295_v6 }
 0x589   :  { %1857 = shalt.err (!%p1854_p2)
}
 0x58a   :  { %s1858_s1 = scalar_lea.hbm %s2059_s9, 128 }
 0x58b   :  { %p1859_p3 = scmp.ne.s32.totalorder %s2059_s9, %s1858_s1  ;;  %p1862_p4 = scmp.lt.u32.totalorder %s1858_s1, %s2059_s9 }
 0x58d   :  { %p1864_p5 = pnand %p1862_p4, %p1859_p3 }
 0x58f   :  { %1867 = shalt.err (!%p1864_p5)
}
 0x590   :  { %1306 = dma.vmem_to_hbm [thread:$0]  %s1304_s11, 128, %s2059_s9, [#allocation4]  }
 0x591   :  { %1874 = dma.done.wait [#allocation4], 128  }
 0x592   :  { %1875 = vsyncadd [#allocation4], 4294967168 }
 0x593   :  { %1310 = vsyncpa [#allocation3], 1 }
 0x594   :  { %1311 = vsyncpa [#allocation6], 1 }
 0x595   :  { %1312 = vsyncpa [#allocation9], 1 }
 0x596   :  { %1313 = vsyncpa [#allocation4], 1 }

</bundles_post_ra>
